<compile_context>
chip_gen: v7x
topology: tpu7x:2x2x1
jax: 0.10.0
libtpu: 0.0.40
codegen_flags: <defaults>
</compile_context>

<pallas_src>
import jax
import jax.numpy as jnp
from jax.experimental import pallas as pl
from jax.experimental.pallas import tpu as pltpu


def _round_up(x, m):
    return ((x + m - 1) // m) * m


def _pick_block_m(M, block_m):
    """M tile: multiple of 16, <= block_m, keeps >= ~4 grid steps when M
    allows, and prefers an exact divisor of M (no padding / no de-pad pass)."""
    cap = max(16, min(block_m, _round_up(pl.cdiv(M, 4), 16)))
    tm = cap
    while tm >= max(16, cap // 2):
        if M % tm == 0:
            return tm
        tm -= 16
    return cap


def _patch_embed_kernel(x_ref, w_ref, b_ref, o_ref):
    # x_ref: (TM, K)  tile of flattened patches (compute dtype, e.g. bf16)
    # w_ref: (K, Np)  conv weight as GEMM matrix, resident across the grid
    # b_ref: (1, Np)  bias (f32)
    # o_ref: (TM, Np)
    acc = jnp.dot(x_ref[...], w_ref[...], preferred_element_type=jnp.float32)
    o_ref[...] = (acc + b_ref[...]).astype(o_ref.dtype)


def patch_embedding_forward(x_nchw, weight, bias, patch_size, *,
                            block_m=2048, compute_dtype=jnp.bfloat16,
                            out_dtype=jnp.bfloat16):
    """x_nchw: (B, C, H, W); weight: (d_model, C, P, P); bias: (d_model,).

    Returns (B, num_patches, d_model), matching PyTorch's
    `conv(x).flatten(2).transpose(1, 2)` (computed in `compute_dtype` with f32
    accumulation; pass compute_dtype=out_dtype=jnp.float32 for exact f32).
    """
    B, C, H, W = x_nchw.shape
    P = patch_size
    d_model = weight.shape[0]
    nph, npw = H // P, W // P
    num_patches = nph * npw

    K = C * P * P
    N = d_model
    M = B * num_patches

    # ---- layout glue (plain JAX; fusable into the kernel's input DMA) ------
    # Cast to compute dtype *before* the im2col so that if XLA does materialize
    # the patch matrix it costs half the HBM traffic.
    xc = x_nchw.astype(compute_dtype)
    # (B, C, H, W) -> (B, C, nph, P, npw, P) -> (B, nph, npw, C, P, P) -> (M, K)
    xp = xc.reshape(B, C, nph, P, npw, P)
    xp = jnp.transpose(xp, (0, 2, 4, 1, 3, 5))
    xp = xp.reshape(M, K)

    # Lane-dense output: pad d_model up to a multiple of 128 (zero columns) so
    # output stores are unmasked vst.
    Np = max(128, _round_up(N, 128))
    w2d = weight.reshape(d_model, K).T.astype(compute_dtype)      # (K, N)
    b1d = bias.astype(jnp.float32)
    if Np != N:
        w2d = jnp.pad(w2d, ((0, 0), (0, Np - N)))
        b1d = jnp.pad(b1d, (0, Np - N))
    b2d = b1d.reshape(1, Np)

    # Tile over M (memory-bound GEMM: bigger tiles amortize the ~0.35 us/step
    # grid overhead; cap keeps >=4 steps so both v7x TensorCores get work).
    TM = _pick_block_m(M, block_m)
    Mp = _round_up(M, TM)
    if Mp != M:
        xp = jnp.pad(xp, ((0, Mp - M), (0, 0)))
    grid = (Mp // TM,)

    in_bytes = jnp.dtype(compute_dtype).itemsize
    out_bytes = jnp.dtype(out_dtype).itemsize
    k_lanes = _round_up(K, 128)   # lane padding of the K<128 dim (HBM & VMEM)
    # Double-buffered x/out tiles + (double-buffered) resident weight + bias.
    vmem_bytes = (2 * TM * k_lanes * in_bytes + 2 * TM * Np * out_bytes
                  + 2 * K * Np * in_bytes + 2 * Np * 4)
    vmem_limit = int(min(max(2 * vmem_bytes, 8 << 20), 48 << 20))

    cost = pl.CostEstimate(
        flops=2 * M * K * N,
        transcendentals=0,
        bytes_accessed=(Mp * k_lanes * in_bytes + K * Np * in_bytes
                        + Np * 4 + Mp * Np * out_bytes),
    )

    out = pl.pallas_call(
        _patch_embed_kernel,
        out_shape=jax.ShapeDtypeStruct((Mp, Np), out_dtype),
        grid_spec=pltpu.PrefetchScalarGridSpec(
            num_scalar_prefetch=0,
            grid=grid,
            in_specs=[
                pl.BlockSpec((TM, K), lambda i: (i, 0)),    # patch rows (tiled)
                pl.BlockSpec((K, Np), lambda i: (0, 0)),    # weight (resident)
                pl.BlockSpec((1, Np), lambda i: (0, 0)),    # bias (resident)
            ],
            out_specs=pl.BlockSpec((TM, Np), lambda i: (i, 0)),
        ),
        compiler_params=pltpu.CompilerParams(
            dimension_semantics=("parallel",),
            vmem_limit_bytes=vmem_limit,
            # Let XLA fold the im2col (reshape/transpose/cast) into this
            # kernel's activation input instead of materializing it in HBM.
            allow_input_fusion=[True, False, False]),
        cost_estimate=cost,
    )(xp, w2d, b2d)

    if Mp != M or Np != N:
        # Only triggers when padding was needed; otherwise the kernel output
        # is returned as-is (no extra HBM pass).
        out = out[:M, :N]
    return out.reshape(B, num_patches, d_model)


if __name__ == "__main__":
    # Shapes consistent with Net defaults: img_size=(32, 32), patch_size=2,
    # d_model=128, 3 input channels; small batch of 2.
    B, C, H, W = 2, 3, 32, 32
    patch_size = 2
    d_model = 128

    key = jax.random.PRNGKey(0)
    kx, kw, kb = jax.random.split(key, 3)

    x = jax.random.normal(kx, (B, C, H, W), dtype=jnp.float32)
    fan_in = C * patch_size * patch_size
    weight = jax.random.normal(kw, (d_model, C, patch_size, patch_size),
                               dtype=jnp.float32) / jnp.sqrt(fan_in)
    bias = jax.random.normal(kb, (d_model,), dtype=jnp.float32) * 0.01

    out = patch_embedding_forward(x, weight, bias, patch_size)
    out = jax.block_until_ready(out)

    nph, npw = H // patch_size, W // patch_size
    assert out.shape == (B, nph * npw, d_model)
    assert out.dtype == jnp.bfloat16
    outf = out.astype(jnp.float32)

    # Reference 1: same bf16-input GEMM math in plain jnp (kernel additionally
    # rounds the stored output to bf16, hence the modest tolerance).
    xr = x.astype(jnp.bfloat16).reshape(B, C, nph, patch_size, npw, patch_size)
    xr = jnp.transpose(xr, (0, 2, 4, 1, 3, 5)).reshape(B * nph * npw, -1)
    wr = weight.reshape(d_model, -1).T.astype(jnp.bfloat16)
    ref_bf16 = (jnp.dot(xr, wr, preferred_element_type=jnp.float32)
                + bias[None, :]).reshape(B, nph * npw, d_model)
    assert jnp.allclose(outf, ref_bf16, atol=5e-2, rtol=5e-2)

    # Reference 2: exact f32 conv semantics (loose tolerance for bf16 compute).
    ref = jax.lax.conv_general_dilated(
        x, weight, window_strides=(patch_size, patch_size), padding="VALID",
        dimension_numbers=("NCHW", "OIHW", "NCHW"))
    ref = ref + bias[None, :, None, None]
    ref = ref.reshape(B, d_model, -1).transpose(0, 2, 1)  # flatten(2).T(1,2)
    assert jnp.allclose(outf, ref, atol=0.15, rtol=0.15)

    print("KERNEL_OK")
</pallas_src>

<mosaic_0001>
module attributes {stable_mosaic.version = 11 : i64} {
  func.func @_patch_embed_kernel(%arg0: i32, %arg1: memref<128x12xbf16, #tpu.memory_space<vmem>>, %arg2: memref<12x128xbf16, #tpu.memory_space<vmem>>, %arg3: memref<1x128xf32, #tpu.memory_space<vmem>>, %arg4: memref<128x128xbf16, #tpu.memory_space<vmem>>) attributes {dimension_semantics = [#tpu.dimension_semantics<parallel>], iteration_bounds = array<i64: 4>, scalar_prefetch = 0 : i64, scratch_operands = 0 : i64, tpu.core_type = #tpu.core_type<tc>, window_params = [{transform_indices = @transform_0, window_bounds = array<i64: 128, 12>}, {pipeline_mode = #tpu.pipeline_mode<synchronous>, transform_indices = @transform_1, window_bounds = array<i64: 12, 128>}, {pipeline_mode = #tpu.pipeline_mode<synchronous>, transform_indices = @transform_2, window_bounds = array<i64: 1, 128>}, {transform_indices = @transform_3, window_bounds = array<i64: 128, 128>}]} {
    %c0 = arith.constant 0 : index
    %c0_0 = arith.constant 0 : index
    %0 = vector.load %arg1[%c0, %c0_0] : memref<128x12xbf16, #tpu.memory_space<vmem>>, vector<128x12xbf16>
    %c0_1 = arith.constant 0 : index
    %c0_2 = arith.constant 0 : index
    %1 = vector.load %arg2[%c0_1, %c0_2] : memref<12x128xbf16, #tpu.memory_space<vmem>>, vector<12x128xbf16>
    %cst = arith.constant dense<0.000000e+00> : vector<128x128xf32>
    %2 = tpu.matmul %0, %1, %cst {dimension_numbers = #tpu.dot_dimension_numbers<[1], [0], [0], [1], [0, 0, 1, 1], [], []>} : vector<128x12xbf16>, vector<12x128xbf16>, vector<128x128xf32> -> vector<128x128xf32>
    %c0_3 = arith.constant 0 : index
    %c0_4 = arith.constant 0 : index
    %3 = vector.load %arg3[%c0_3, %c0_4] : memref<1x128xf32, #tpu.memory_space<vmem>>, vector<1x128xf32>
    %4 = vector.broadcast %3 : vector<1x128xf32> to vector<128x128xf32>
    %5 = arith.addf %2, %4 : vector<128x128xf32>
    %6 = arith.truncf %5 : vector<128x128xf32> to vector<128x128xbf16>
    %c0_5 = arith.constant 0 : index
    %c0_6 = arith.constant 0 : index
    %7 = vector.load %arg4[%c0_5, %c0_6] : memref<128x128xbf16, #tpu.memory_space<vmem>>, vector<128x128xbf16>
    tpu.vector_store %arg4[%c0_5, %c0_6], %6 {strides = array<i32>} : memref<128x128xbf16, #tpu.memory_space<vmem>>, vector<128x128xbf16>,
    return
  }
  func.func @transform_0(%arg0: i32) -> (i32, i32) {
    %c0_i32 = arith.constant 0 : i32
    %c0_i32_0 = arith.constant 0 : i32
    return %arg0, %c0_i32 : i32, i32
  }
  func.func @transform_1(%arg0: i32) -> (i32, i32) {
    %c0_i32 = arith.constant 0 : i32
    %c0_i32_0 = arith.constant 0 : i32
    %c0_i32_1 = arith.constant 0 : i32
    return %c0_i32, %c0_i32_0 : i32, i32
  }
  func.func @transform_2(%arg0: i32) -> (i32, i32) {
    %c0_i32 = arith.constant 0 : i32
    %c0_i32_0 = arith.constant 0 : i32
    %c0_i32_1 = arith.constant 0 : i32
    return %c0_i32, %c0_i32_0 : i32, i32
  }
  func.func @transform_3(%arg0: i32) -> (i32, i32) {
    %c0_i32 = arith.constant 0 : i32
    %c0_i32_0 = arith.constant 0 : i32
    return %arg0, %c0_i32 : i32, i32
  }
}

</mosaic_0001>

<bundles_post_ra>
// kernel: tpu_custom_call.1
= control target key start
LH: loop header
LB: loop body
LE: loop exit
PB: predicated region body
PF: predicated region fallthrough
CT: control target
= control target key end

     0   :  { %8 = vsyncpa [#allocation3], 0  ;;  %s934_s0 = inlined_call_operand.vmem [shape: bf16[512,12], index: 0, kind: input, shape index: {}]   ;;  %s935_s1 = inlined_call_operand.vmem [shape: bf16[12,128], index: 1, kind: input, shape index: {}]   ;;  %s936_s2 = inlined_call_operand.vmem [shape: f32[1,128], index: 2, kind: input, shape index: {}]   ;;  %s937_s3 = inlined_call_operand.hbm [shape: bf16[512,128], index: 3, kind: output, shape index: {}]  }
   0x1   :  { %10 = vsyncpa [#allocation3 + $0x1], 0  ;;  %s803_s12 = smov 0   ;;  %s805_s13 = smov 0  }
   0x2   :  { %s807_s14 = smov 0   ;;  %s809_s15 = smov 0  }
   0x3 LB: > { %s824_s16 = sadd.s32 4294967295, %s778_s15   ;;  %s525_s17 = sadd.s32 4294967294, %s778_s15   ;;  %s778_s15 = sphi %s809_s15, %s943_s15   ;;  %s774_s14 = sphi %s807_s14, %s942_s14   ;;  %s770_s13 = sphi %s805_s13, %s941_s13   ;;  %s766_s12 = sphi %s803_s12, %s940_s12  }
   0x4   : > { %s828_s18 = sadd.s32 1, %s778_s15   ;;  %s91_s19 = sadd.s32 1, %s774_s14 }
   0x5   : > { %s88_s20 = ssub.s32 %s778_s15, %s828_s18  ;;  %p101_p0 = scmp.ne.s32.totalorder %s774_s14, %s770_s13 }
   0x6   : > { %p89_p1 = scmp.eq.s32.totalorder %s88_s20, 0  ;;  %p102_p2 = scmp.eq.s32.totalorder %s824_s16, 3 }
   0x7   : > { %p107_p3 = scmp.ne.s32.totalorder %s770_s13, %s766_s12  ;;  %p108_p4 = scmp.eq.s32.totalorder %s525_s17, 3 }
   0x8   : > { %s839_s21 = scalar_select %p89_p1, %s774_s14, %s91_s19  }
   0x9   : > { %p841_p5 = por %p102_p2, %p101_p0  ;;  %p845_p6 = por %p108_p4, %p107_p3 }
   0xa   : > { %p528_p7 = scmp.ge.s32.totalorder %s778_s15, 1  ;;  %p141_p8 = scmp.lt.s32.totalorder %s778_s15, 5 }
   0xc   : > { %p142_p9 = pnand %p528_p7, %p141_p8 }
   0xd   : > { %v707_v0 = vld [vmem:[%s935_s1] sm:$0x3f] (!%p142_p9)   ;;  %vm268_vm0 = vcmask (!%p142_p9), 1045504   ;;  %s530_s26 = sshll.u32 (!%p142_p9), %s824_s16, 4  ;;  %vm243_vm1 = vcmask (!%p142_p9), 97280   ;;  %s162_s4 = sand.u32 (!%p142_p9), 1, %s770_s13  }
   0xe   : > { %145 = sbr.rel (%p142_p9) target bundleno = 269 (0x10d), region = 32  ;;  %664 = vmatprep.subr.msk.bf16.mxu0 (!%p142_p9), %vm268_vm0, %v707_v0  ;;  %665 = vmatprep.subr.msk.bf16.mxu1 (!%p142_p9), %vm268_vm0, %v707_v0  ;;  %v270_v1 = vsel (!%p142_p9), %vm268_vm0, %v707_v0, 0  ;;  %p166_p10 = scmp.lt.s32.totalorder (!%p142_p9), %s530_s26, 63  ;;  %v532_v11 = vld [vmem:[%s936_s2] ss:$0 sm:$0xff] (!%p142_p9) }
   0xf   : > { %645 = vmatpush3.bf16.msra.mxu0 (!%p142_p9), %v270_v1  ;;  %663 = vmatpush3.bf16.msra.mxu1 (!%p142_p9), %v270_v1  ;;  %s529_s7 = sshll.u32 (!%p142_p9), %s162_s4, 6  ;;  %s587_s9 = sshll.u32 (!%p142_p9), %s824_s16, 10 }
  0x10   : > { %s872_s8 = scalar_lea.vmem (!%p142_p9), [#allocation2], %s529_s7  ;;  %s883_s16 = scalar_lea.hbm (!%p142_p9), %s937_s3, %s587_s9 }
  0x11   : > { %s463_s10 = sshll.u32 (!%p142_p9), %s872_s8, 4  ;;  %s893_s19 = scalar_lea.sflag (!%p142_p9), [#allocation3], %s162_s4  ;;  %s885_s10 = int_to_ptr.vmem [resolvable:$true] %s463_s10 }
  0x12   : > { %s716_s20 = scalar_lea.vmem (!%p142_p9), %s885_s10, 1024  ;;  %s780_s24 = smov (!%p142_p9), [#allocation2]  }
  0x13   : > { %p717_p11 = scmp.ne.s32.totalorder (!%p142_p9), %s885_s10, %s716_s20  ;;  %s720_s25 = sshll.u32 (!%p142_p9), %s780_s24, 4  ;;  %s721_s25 = int_to_ptr.vmem [resolvable:$false] %s720_s25 }
  0x14   : > { %p723_p0 = scmp.lt.s32.totalorder (!%p142_p9), %s885_s10, %s721_s25 }
  0x15   : > { %s945_s26 = smov (!%p166_p10, %s530_s26), 63  ;;  %p718_p12 = pnand %p717_p11, %p841_p5 }
  0x16   : > { %s531_s27 = sshll.u32 %s945_s26, 2  ;;  %s722_s26 = scalar_lea.vmem %s721_s25, 2048 }
  0x17   : > { %s169_s30 = scalar_lea.vmem %s934_s0, %s531_s27  ;;  %p719_p13 = pneg %p718_p12 }
  0x18   : > { %v708_v2 = vld [vmem:[%s169_s30] sm:$0xff]   ;;  %v710_v4 = vld [vmem:[%s169_s30 + $0x8] sm:$0xff]   ;;  %v712_v6 = vld [vmem:[%s169_s30 + $0x10] sm:$0xff]   ;;  %p724_p1 = scmp.lt.s32.totalorder %s722_s26, %s716_s20 }
  0x19   : > { %v709_v3 = vld [vmem:[%s169_s30 + $0x20] sm:$0xff]   ;;  %646 = vmatprep.mubr.msk.bf16.mxu0 %vm243_vm1, %v708_v2  ;;  %v711_v5 = vld [vmem:[%s169_s30 + $0x28] sm:$0xff]   ;;  %v713_v7 = vld [vmem:[%s169_s30 + $0x30] sm:$0xff]  }
  0x1a   : > { %654 = vmatprep.mubr.msk.bf16.mxu1 %vm243_vm1, %v709_v3  ;;  %647 = vmatmul.mubr.msk.bf16.vlgmr.msra.gmra.mrb[0].mxu0 %vm243_vm1, %v710_v4  ;;  %v714_v8 = vld [vmem:[%s169_s30 + $0x18] sm:$0xff]   ;;  %p725_p2 = por %p724_p1, %p723_p0 }
  0x1b   : > { %655 = vmatmul.mubr.msk.bf16.vlgmr.msra.gmra.mrb[0].mxu1 %vm243_vm1, %v711_v5  ;;  %650 = vmatprep.mubr.msk.bf16.mxu0 %vm243_vm1, %v712_v6  ;;  %v715_v9 = vld [vmem:[%s169_s30 + $0x38] sm:$0xff]  }
  0x1c   : > { %658 = vmatprep.mubr.msk.bf16.mxu1 %vm243_vm1, %v713_v7  ;;  %p726_p3 = pnand %p725_p2, %p719_p13 }
  0x22   : > { %651 = vmatmul.mubr.msk.bf16.gmra.mrb[4].mxu0 %vm243_vm1, %v714_v8 }
  0x23   : > { %659 = vmatmul.mubr.msk.bf16.gmra.mrb[4].mxu1 %vm243_vm1, %v715_v9 }
  0xed   : > { %v648_v10 = vpop.f32.mrb[0].mxu0 }
  0xee   : > { %v656_v12 = vpop.f32.mrb[0].mxu1  ;;  %v306_v13 = vpop.f32.mrb[1].mxu0  ;;  %v315_v16 = vadd.f32 %v648_v10, %v532_v11 }
  0xef   : > { %v338_v14 = vpop.f32.mrb[1].mxu1  ;;  %v649_v15 = vpop.f32.mrb[2].mxu0  ;;  %v347_v20 = vadd.f32 %v656_v12, %v532_v11  ;;  %v307_v21 = vadd.f32 %v532_v11, %v306_v13 }
  0xf0   : > { %v318_v17 = vadd.f32 %v649_v15, %v532_v11  ;;  %v657_v18 = vpop.f32.mrb[2].mxu1  ;;  %v309_v19 = vpop.f32.mrb[3].mxu0  ;;  %v339_v25 = vadd.f32 %v532_v11, %v338_v14 }
  0xf1   : > { %v350_v22 = vadd.f32 %v657_v18, %v532_v11  ;;  %v310_v23 = vadd.f32 %v532_v11, %v309_v19  ;;  %v341_v24 = vpop.f32.mrb[3].mxu1 }
  0xf2   : > { %v596_v26 = vpack.c.bf16 %v318_v17, %v315_v16  ;;  %v342_v27 = vadd.f32 %v532_v11, %v341_v24 }
  0xf3   : > { %v616_v28 = vpack.c.bf16 %v350_v22, %v347_v20  ;;  %v591_v29 = vpack.c.bf16 %v310_v23, %v307_v21 }
  0xf4   : > { %628 = vst [vmem:[%s872_s8 + $0x8] sm:$0xff] %v596_v26   ;;  %v611_v30 = vpack.c.bf16 %v342_v27, %v339_v25 }
  0xf5   : > { %632 = vst [vmem:[%s872_s8 + $0x28] sm:$0xff] %v616_v28   ;;  %592 = vst [vmem:[%s872_s8] sm:$0xff] %v591_v29   ;;  %v652_v31 = vpop.f32.mrb[4].mxu0 }
  0xf6   : > { %631 = vst [vmem:[%s872_s8 + $0x20] sm:$0xff] %v611_v30   ;;  %v660_v32 = vpop.f32.mrb[4].mxu1  ;;  %v322_v33 = vpop.f32.mrb[5].mxu0  ;;  %v331_v36 = vadd.f32 %v652_v31, %v532_v11 }
  0xf7   : > { %v354_v34 = vpop.f32.mrb[5].mxu1  ;;  %v653_v35 = vpop.f32.mrb[6].mxu0  ;;  %v363_v40 = vadd.f32 %v660_v32, %v532_v11  ;;  %v323_v41 = vadd.f32 %v532_v11, %v322_v33 }
  0xf8   : > { %v334_v37 = vadd.f32 %v653_v35, %v532_v11  ;;  %v661_v38 = vpop.f32.mrb[6].mxu1  ;;  %v325_v39 = vpop.f32.mrb[7].mxu0  ;;  %v355_v45 = vadd.f32 %v532_v11, %v354_v34 }
  0xf9   : > { %v366_v42 = vadd.f32 %v661_v38, %v532_v11  ;;  %v326_v43 = vadd.f32 %v532_v11, %v325_v39  ;;  %v357_v44 = vpop.f32.mrb[7].mxu1 }
  0xfa   : > { %v606_v46 = vpack.c.bf16 %v334_v37, %v331_v36  ;;  %v358_v47 = vadd.f32 %v532_v11, %v357_v44 }
  0xfb   : > { %v626_v48 = vpack.c.bf16 %v366_v42, %v363_v40  ;;  %v601_v49 = vpack.c.bf16 %v326_v43, %v323_v41 }
  0xfc   : > { %630 = vst [vmem:[%s872_s8 + $0x18] sm:$0xff] %v606_v46   ;;  %v621_v50 = vpack.c.bf16 %v358_v47, %v355_v45 }
  0xfd   : > { %634 = vst [vmem:[%s872_s8 + $0x38] sm:$0xff] %v626_v48   ;;  %629 = vst [vmem:[%s872_s8 + $0x10] sm:$0xff] %v601_v49  }
  0xfe   : > { %633 = vst [vmem:[%s872_s8 + $0x30] sm:$0xff] %v621_v50  }
  0xff   : > { %729 = shalt.err (!%p726_p3)
}
 0x100   : > { %s730_s27 = scalar_lea.hbm %s883_s16, 1024  ;;  %s734_s30 = scalar_lea.hbm %s937_s3, 4096 }
 0x101   : > { %p731_p4 = scmp.ne.s32.totalorder %s883_s16, %s730_s27  ;;  %p735_p9 = scmp.lt.u32.totalorder %s883_s16, %s937_s3 }
 0x102   : > { %p736_p10 = scmp.lt.u32.totalorder %s734_s30, %s730_s27  ;;  %p738_p12 = scmp.lt.u32.totalorder %s730_s27, %s883_s16 }
 0x103   : > { %p732_p7 = pnand %p731_p4, %p841_p5 }
 0x104   : > { %p737_p11 = por %p736_p10, %p735_p9 }
 0x105   : > { %p733_p8 = pneg %p732_p7 }
 0x106   : > { %p739_p13 = por %p738_p12, %p737_p11 }
 0x108   : > { %p740_p0 = pnand %p739_p13, %p733_p8 }
 0x10a   : > { %743 = shalt.err (!%p740_p0)
}
 0x10b   : > { %s781_s6 = smov 64   ;;  %s782_s7 = smov 4  }
 0x10c   : > { %666 = dma.vmem_to_hbm [thread:$0]  (%p841_p5), %s885_s10, 1024, %s883_s16, %s893_s19, %s781_s6, %s781_s6, %s782_s7  }
 0x10d PF: > { %p672_p1 = scmp.ge.s32.totalorder %s778_s15, 2  ;;  %s478_s8 = sand.u32 1, %s766_s12  }
 0x10e   : > { %s479_s9 = scalar_lea.sflag [#allocation3], %s478_s8 }
 0x10f   : > { %p669_p2 = pnand %p672_p1, %p845_p6 }
 0x111   : > { %761 = dma.done.wait (!%p669_p2), %s479_s9, 1024  }
 0x112   : > { %763 = vsyncadd (!%p669_p2), %s479_s9, 4294966272  ;;  %p13_p3 = scmp.ge.s32.totalorder %s828_s18, 6   ;;  %s940_s12 = smov %s770_s13 }
 0x113   : > { %s941_s13 = smov %s774_s14  ;;  %s942_s14 = smov %s839_s21 }
 0x114   : > { %s943_s15 = smov %s828_s18  ;;  %15 = sbr.rel (!%p13_p3) target bundleno = 3 (0x3), region = 67 }
 0x11b   :  { %484 = vsyncpa [#allocation3], 1 }
 0x11c   :  { %486 = vsyncpa [#allocation3 + $0x1], 1 }

</bundles_post_ra>
